<compile_context>
chip_gen: v7x
topology: tpu7x:2x2x1
jax: 0.10.0
libtpu: 0.0.40
codegen_flags: <defaults>
</compile_context>

<pallas_src>
import jax
import jax.numpy as jnp
from jax import lax
from jax.experimental import pallas as pl
from jax.experimental.pallas import tpu as pltpu


_NEG_INF = -1e30  # finite mask value avoids (-inf) - (-inf) = nan corner cases


def _round_up(n, m):
    return ((n + m - 1) // m) * m


def _pick_tiles(hw, batch):
    """Asymmetric flash tiles: big tq (HBM reuse), moderate tk (VMEM temporaries)."""
    hw128 = _round_up(hw, 128)
    cap = 1024
    if batch == 1 and hw128 >= 256:
        cap = hw128 // 2  # keep >= 2 parallel q tiles for v7x's two TensorCores
    tq = 128
    while tq * 2 <= cap and tq * 2 <= hw128:
        tq *= 2
    tk = min(256, tq)
    return tq, tk


def _proj_kernel(x_ref, w_ref, b_ref, th_ref, pg_ref):
    """Fused theta|phi|g 1x1-conv projection of one row tile (done ONCE per row)."""
    cip = th_ref.shape[-1]
    tpg = jnp.dot(x_ref[...].astype(jnp.bfloat16), w_ref[...],
                  preferred_element_type=jnp.float32) + b_ref[...]   # (tq, 3*Cip) f32
    th_ref[...] = tpg[:, :cip].astype(jnp.bfloat16)                  # theta
    pg_ref[...] = tpg[:, cip:].astype(jnp.bfloat16)                  # [phi | g]


def _flash_kernel(th_ref, pg_ref, kb_ref, xres_ref, ww_ref, bw_ref, o_ref,
                  m_scr, l_scr, acc_scr):
    # th_ref:  (tq, Cip)  bf16   query projection (fetched once per q tile)
    # pg_ref:  (tk, 2Cip) bf16   [phi | g] kv stream (bf16, pre-projected)
    # kb_ref:  (1, tk)    f32    additive key mask (0 valid, -1e30 padded)
    # xres_ref:(tq, Cp)   f32    residual input rows
    # ww_ref:  (Cip, Cp)  bf16   output 1x1-conv weight; bw_ref: (1, Cp) f32 bias
    k = pl.program_id(2)
    cip = acc_scr.shape[-1]

    @pl.when(k == 0)
    def _init():
        m_scr[...] = jnp.full_like(m_scr, -jnp.inf)
        l_scr[...] = jnp.zeros_like(l_scr)
        acc_scr[...] = jnp.zeros_like(acc_scr)

    pg = pg_ref[...]                     # (tk, 2*Cip) bf16
    ph = pg[:, :cip]                     # (tk, Cip)   bf16
    g = pg[:, cip:]                      # (tk, Cip)   bf16

    # Scores: contract the channel dims directly (no explicit transpose).
    s = lax.dot_general(th_ref[...], ph,
                        dimension_numbers=(((1,), (1,)), ((), ())),
                        preferred_element_type=jnp.float32)          # (tq, tk)
    s = s + kb_ref[...]                  # mask padded keys

    # Online softmax update (f32 on VPU/EUP).
    m_prev = m_scr[...]
    m_new = jnp.maximum(m_prev, jnp.max(s, axis=-1, keepdims=True))
    alpha = jnp.exp(m_prev - m_new)
    p = jnp.exp(s - m_new)
    l_scr[...] = alpha * l_scr[...] + jnp.sum(p, axis=-1, keepdims=True)
    acc_scr[...] = alpha * acc_scr[...] + jnp.dot(
        p.astype(jnp.bfloat16), g, preferred_element_type=jnp.float32)
    m_scr[...] = m_new

    @pl.when(k == pl.num_programs(2) - 1)
    def _finalize():
        y = acc_scr[...] * pl.reciprocal(l_scr[...], approx=True)    # (tq, Cip)
        wy = jnp.dot(y.astype(jnp.bfloat16), ww_ref[...],
                     preferred_element_type=jnp.float32) + bw_ref[...]  # (tq, Cp)
        o_ref[...] = (wy + xres_ref[...]).astype(o_ref.dtype)


def nonlocal_block_2d(x_nchw, params, *, tq=None, tk=None):
    """x_nchw: (B, C, H, W) float32. params: dict (see init_params)."""
    B, C, H, W = x_nchw.shape
    Ci = params["wg"].shape[1]
    HW = H * W

    Cp = _round_up(C, 128)       # lane-align channel dims
    Cip = _round_up(Ci, 128)

    auto_tq, auto_tk = _pick_tiles(HW, B)
    if tq is None:
        tq = auto_tq
    if tk is None:
        tk = auto_tk
    assert tq % tk == 0, "tk must divide tq"
    HWp = _round_up(HW, tq)      # multiple of both tq and tk
    nq, nk = HWp // tq, HWp // tk

    # NCHW -> (B, HW, C); pad rows to HWp and channels to Cp with zeros.
    x_flat = jnp.transpose(x_nchw, (0, 2, 3, 1)).reshape(B, HW, C)
    x_p = jnp.pad(x_flat, ((0, 0), (0, HWp - HW), (0, Cp - C)))

    def pad2(w, r, c):
        return jnp.pad(w, ((0, r - w.shape[0]), (0, c - w.shape[1])))

    # Fused projection weights [theta | phi | g].  Padded rows/cols are zero,
    # so padded channels contribute exactly zero to the attention scores.
    # The phi bias is dropped (softmax invariant to per-query constants).
    w_all = jnp.concatenate([pad2(params["wt"], Cp, Cip),
                             pad2(params["wp"], Cp, Cip),
                             pad2(params["wg"], Cp, Cip)], axis=1).astype(jnp.bfloat16)
    b_all = jnp.concatenate([pad2(params["bt"], 1, Cip),
                             jnp.zeros((1, Cip), jnp.float32),
                             pad2(params["bg"], 1, Cip)], axis=1)
    ww = pad2(params["ww"], Cip, Cp).astype(jnp.bfloat16)
    bw = pad2(params["bw"], 1, Cp)

    # Additive key-mask bias: 0 for valid rows, -1e30 for padded rows.
    kb = jnp.where(jnp.arange(HWp) < HW, 0.0, _NEG_INF).astype(jnp.float32)
    kb = kb.reshape(1, HWp)

    # ---- stage 1: per-row projections (computed once, stored bf16) ----
    theta_b, phig_b = pl.pallas_call(
        _proj_kernel,
        out_shape=(jax.ShapeDtypeStruct((B, HWp, Cip), jnp.bfloat16),
                   jax.ShapeDtypeStruct((B, HWp, 2 * Cip), jnp.bfloat16)),
        grid_spec=pltpu.PrefetchScalarGridSpec(
            num_scalar_prefetch=0,
            grid=(B, nq),
            in_specs=[
                pl.BlockSpec((None, tq, Cp), lambda b, i: (b, i, 0)),
                pl.BlockSpec((Cp, 3 * Cip), lambda b, i: (0, 0)),
                pl.BlockSpec((1, 3 * Cip), lambda b, i: (0, 0)),
            ],
            out_specs=[
                pl.BlockSpec((None, tq, Cip), lambda b, i: (b, i, 0)),
                pl.BlockSpec((None, tq, 2 * Cip), lambda b, i: (b, i, 0)),
            ],
        ),
        compiler_params=pltpu.CompilerParams(
            dimension_semantics=("parallel", "parallel")),
    )(x_p, w_all, b_all)

    # ---- stage 2: flash attention + output 1x1 conv + residual ----
    # VMEM budget: double-buffered blocks + weights + scratch + s/p temporaries.
    vmem_bytes = (
        2 * tq * Cip * 2                    # theta block (bf16)
        + 2 * tk * 2 * Cip * 2              # phi|g block (bf16)
        + 2 * 8 * tk * 4                    # key-mask bias (sublane padded)
        + 2 * tq * Cp * 4                   # residual x block (f32)
        + 2 * (Cip * Cp * 2 + 8 * Cp * 4)   # W weight + bias
        + 2 * tq * Cp * 4                   # output block (f32)
        + tq * (Cip + 2 * 128) * 4          # scratch acc + m + l (lane padded)
        + 6 * tq * tk * 4)                  # s / p / exp temporaries headroom
    vmem_limit = int(min(64 * 1024 * 1024, max(16 * 1024 * 1024, 2 * vmem_bytes)))

    flops = int(2 * B * (2 * HWp * HWp * Cip + HWp * Cip * Cp))
    bytes_accessed = int(
        B * HWp * Cip * 2                   # theta read once per q tile
        + B * nq * HWp * 2 * Cip * 2        # phi|g re-read nq times (real factor)
        + B * HWp * Cp * 4                  # residual x read
        + B * HWp * Cp * 4                  # output write
        + Cip * Cp * 2 + Cp * 4 + HWp * 4)  # weights / mask
    cost = pl.CostEstimate(flops=flops, transcendentals=int(B * HWp * HWp),
                           bytes_accessed=bytes_accessed)

    out_p = pl.pallas_call(
        _flash_kernel,
        out_shape=jax.ShapeDtypeStruct((B, HWp, Cp), jnp.float32),
        grid_spec=pltpu.PrefetchScalarGridSpec(
            num_scalar_prefetch=0,
            grid=(B, nq, nk),
            in_specs=[
                pl.BlockSpec((None, tq, Cip), lambda b, i, k: (b, i, 0)),     # theta
                pl.BlockSpec((None, tk, 2 * Cip), lambda b, i, k: (b, k, 0)), # phi|g
                pl.BlockSpec((1, tk), lambda b, i, k: (0, k)),                # key mask
                pl.BlockSpec((None, tq, Cp), lambda b, i, k: (b, i, 0)),      # residual x
                pl.BlockSpec((Cip, Cp), lambda b, i, k: (0, 0)),              # W weight
                pl.BlockSpec((1, Cp), lambda b, i, k: (0, 0)),                # W bias
            ],
            out_specs=pl.BlockSpec((None, tq, Cp), lambda b, i, k: (b, i, 0)),
            scratch_shapes=[
                pltpu.VMEM((tq, 1), jnp.float32),    # running max m
                pltpu.VMEM((tq, 1), jnp.float32),    # running sum l
                pltpu.VMEM((tq, Cip), jnp.float32),  # output accumulator
            ],
        ),
        compiler_params=pltpu.CompilerParams(
            dimension_semantics=("parallel", "parallel", "arbitrary"),
            vmem_limit_bytes=vmem_limit,
        ),
        cost_estimate=cost,
    )(theta_b, phig_b, kb, x_p, ww, bw)

    out = out_p[:, :HW, :C]
    return jnp.transpose(out.reshape(B, H, W, C), (0, 3, 1, 2))


def _reference(x_nchw, params):
    """Pure-JAX reference mirroring the PyTorch forward exactly (f32)."""
    B, C, H, W = x_nchw.shape
    x = jnp.transpose(x_nchw, (0, 2, 3, 1)).reshape(B, H * W, C)
    g = x @ params["wg"] + params["bg"]
    th = x @ params["wt"] + params["bt"]
    ph = x @ params["wp"] + params["bp"]
    f = jnp.einsum("bnc,bmc->bnm", th, ph)
    p = jax.nn.softmax(f, axis=-1)
    y = jnp.einsum("bnm,bmc->bnc", p, g)
    z = y @ params["ww"] + params["bw"] + x
    return jnp.transpose(z.reshape(B, H, W, C), (0, 3, 1, 2))


def init_params(key, in_channels, inter_channels, zero_w=True):
    k1, k2, k3, k4, k5, k6, k7, k8 = jax.random.split(key, 8)
    s = 1.0 / (in_channels ** 0.5)
    # 1x1 conv weights stored as (in, out) so y = x @ W + b.
    params = {
        "wg": jax.random.uniform(k1, (in_channels, inter_channels), jnp.float32, -s, s),
        "bg": jax.random.uniform(k2, (1, inter_channels), jnp.float32, -s, s),
        "wt": jax.random.uniform(k3, (in_channels, inter_channels), jnp.float32, -s, s),
        "bt": jax.random.uniform(k4, (1, inter_channels), jnp.float32, -s, s),
        "wp": jax.random.uniform(k5, (in_channels, inter_channels), jnp.float32, -s, s),
        "bp": jax.random.uniform(k6, (1, inter_channels), jnp.float32, -s, s),
    }
    if zero_w:
        # nn.init.constant_(W.weight, 0); nn.init.constant_(W.bias, 0)
        params["ww"] = jnp.zeros((inter_channels, in_channels), jnp.float32)
        params["bw"] = jnp.zeros((1, in_channels), jnp.float32)
    else:
        sw = 1.0 / (inter_channels ** 0.5)
        params["ww"] = jax.random.uniform(k7, (inter_channels, in_channels), jnp.float32, -sw, sw)
        params["bw"] = jax.random.uniform(k8, (1, in_channels), jnp.float32, -sw, sw)
    return params


if __name__ == "__main__":
    key = jax.random.PRNGKey(0)
    kx, kp, kw, kx2, kp2 = jax.random.split(key, 5)

    B, C, H, W = 2, 4, 16, 16
    inter = 2
    x = jax.random.normal(kx, (B, C, H, W), jnp.float32)

    # 1) Faithful module init (W zeroed) -> output equals input exactly.
    params = init_params(kp, C, inter, zero_w=True)
    out = jax.block_until_ready(nonlocal_block_2d(x, params))
    ref = _reference(x, params)
    assert out.shape == (B, C, H, W)
    assert jnp.allclose(out, ref, atol=1e-5, rtol=1e-5), "mismatch vs reference (zero-W init)"

    # 2) Non-zero W: exercises the full attention path; tolerance reflects
    #    bf16 MXU operands (f32 accumulation) inside the kernels.
    params_nz = init_params(kw, C, inter, zero_w=False)
    out_nz = jax.block_until_ready(nonlocal_block_2d(x, params_nz))
    ref_nz = _reference(x, params_nz)
    rel_err = jnp.max(jnp.abs(out_nz - ref_nz)) / (jnp.max(jnp.abs(ref_nz)) + 1e-6)
    assert rel_err < 5e-2, f"mismatch vs reference (random W), rel_err={rel_err}"

    # 3) Non-tile-aligned H*W (exercises row padding + key-masking path), B=1.
    B2, C2, H2, W2, inter2 = 1, 4, 10, 12, 2
    x2 = jax.random.normal(kx2, (B2, C2, H2, W2), jnp.float32)
    params2 = init_params(kp2, C2, inter2, zero_w=False)
    out2 = jax.block_until_ready(nonlocal_block_2d(x2, params2))
    ref2 = _reference(x2, params2)
    rel_err2 = jnp.max(jnp.abs(out2 - ref2)) / (jnp.max(jnp.abs(ref2)) + 1e-6)
    assert out2.shape == (B2, C2, H2, W2)
    assert rel_err2 < 5e-2, f"mismatch vs reference (padded HW), rel_err={rel_err2}"

    print("KERNEL_OK")
</pallas_src>

<mosaic_0001>
module attributes {stable_mosaic.version = 11 : i64} {
  func.func @_proj_kernel(%arg0: i32, %arg1: i32, %arg2: memref<1x256x128xf32, #tpu.memory_space<vmem>>, %arg3: memref<128x384xbf16, #tpu.memory_space<vmem>>, %arg4: memref<1x384xf32, #tpu.memory_space<vmem>>, %arg5: memref<1x256x128xbf16, #tpu.memory_space<vmem>>, %arg6: memref<1x256x256xbf16, #tpu.memory_space<vmem>>) attributes {dimension_semantics = [#tpu.dimension_semantics<parallel>, #tpu.dimension_semantics<parallel>], iteration_bounds = array<i64: 2, 1>, scalar_prefetch = 0 : i64, scratch_operands = 0 : i64, tpu.core_type = #tpu.core_type<tc>, window_params = [{transform_indices = @transform_0, window_bounds = array<i64: 1, 256, 128>}, {pipeline_mode = #tpu.pipeline_mode<synchronous>, transform_indices = @transform_1, window_bounds = array<i64: 128, 384>}, {pipeline_mode = #tpu.pipeline_mode<synchronous>, transform_indices = @transform_2, window_bounds = array<i64: 1, 384>}, {transform_indices = @transform_3, window_bounds = array<i64: 1, 256, 128>}, {transform_indices = @transform_4, window_bounds = array<i64: 1, 256, 256>}]} {
    %c0 = arith.constant 0 : index
    %c0_0 = arith.constant 0 : index
    %c0_1 = arith.constant 0 : index
    %0 = vector.load %arg2[%c0, %c0_0, %c0_1] : memref<1x256x128xf32, #tpu.memory_space<vmem>>, vector<1x256x128xf32>
    %1 = vector.shape_cast %0 : vector<1x256x128xf32> to vector<256x128xf32>
    %2 = arith.truncf %1 : vector<256x128xf32> to vector<256x128xbf16>
    %c0_2 = arith.constant 0 : index
    %c0_3 = arith.constant 0 : index
    %3 = vector.load %arg3[%c0_2, %c0_3] : memref<128x384xbf16, #tpu.memory_space<vmem>>, vector<128x384xbf16>
    %cst = arith.constant dense<0.000000e+00> : vector<256x384xf32>
    %4 = tpu.matmul %2, %3, %cst {dimension_numbers = #tpu.dot_dimension_numbers<[1], [0], [0], [1], [0, 0, 1, 1], [], []>} : vector<256x128xbf16>, vector<128x384xbf16>, vector<256x384xf32> -> vector<256x384xf32>
    %c0_4 = arith.constant 0 : index
    %c0_5 = arith.constant 0 : index
    %5 = vector.load %arg4[%c0_4, %c0_5] : memref<1x384xf32, #tpu.memory_space<vmem>>, vector<1x384xf32>
    %6 = vector.broadcast %5 : vector<1x384xf32> to vector<256x384xf32>
    %7 = arith.addf %4, %6 : vector<256x384xf32>
    %8 = vector.extract_strided_slice %7 {offsets = [0, 0], sizes = [256, 128], strides = [1, 1]} : vector<256x384xf32> to vector<256x128xf32>
    %9 = arith.truncf %8 : vector<256x128xf32> to vector<256x128xbf16>
    %c0_6 = arith.constant 0 : index
    %c0_7 = arith.constant 0 : index
    %c0_8 = arith.constant 0 : index
    %10 = vector.load %arg5[%c0_6, %c0_7, %c0_8] : memref<1x256x128xbf16, #tpu.memory_space<vmem>>, vector<1x256x128xbf16>
    %11 = vector.shape_cast %10 : vector<1x256x128xbf16> to vector<256x128xbf16>
    %12 = vector.shape_cast %9 : vector<256x128xbf16> to vector<1x256x128xbf16>
    tpu.vector_store %arg5[%c0_6, %c0_7, %c0_8], %12 {strides = array<i32>} : memref<1x256x128xbf16, #tpu.memory_space<vmem>>, vector<1x256x128xbf16>,
    %13 = vector.extract_strided_slice %7 {offsets = [0, 128], sizes = [256, 256], strides = [1, 1]} : vector<256x384xf32> to vector<256x256xf32>
    %14 = arith.truncf %13 : vector<256x256xf32> to vector<256x256xbf16>
    %c0_9 = arith.constant 0 : index
    %c0_10 = arith.constant 0 : index
    %c0_11 = arith.constant 0 : index
    %15 = vector.load %arg6[%c0_9, %c0_10, %c0_11] : memref<1x256x256xbf16, #tpu.memory_space<vmem>>, vector<1x256x256xbf16>
    %16 = vector.shape_cast %15 : vector<1x256x256xbf16> to vector<256x256xbf16>
    %17 = vector.shape_cast %14 : vector<256x256xbf16> to vector<1x256x256xbf16>
    tpu.vector_store %arg6[%c0_9, %c0_10, %c0_11], %17 {strides = array<i32>} : memref<1x256x256xbf16, #tpu.memory_space<vmem>>, vector<1x256x256xbf16>,
    return
  }
  func.func @transform_0(%arg0: i32, %arg1: i32) -> (i32, i32, i32) {
    %c0_i32 = arith.constant 0 : i32
    %c0_i32_0 = arith.constant 0 : i32
    return %arg0, %arg1, %c0_i32 : i32, i32, i32
  }
  func.func @transform_1(%arg0: i32, %arg1: i32) -> (i32, i32) {
    %c0_i32 = arith.constant 0 : i32
    %c0_i32_0 = arith.constant 0 : i32
    %c0_i32_1 = arith.constant 0 : i32
    return %c0_i32, %c0_i32_0 : i32, i32
  }
  func.func @transform_2(%arg0: i32, %arg1: i32) -> (i32, i32) {
    %c0_i32 = arith.constant 0 : i32
    %c0_i32_0 = arith.constant 0 : i32
    %c0_i32_1 = arith.constant 0 : i32
    return %c0_i32, %c0_i32_0 : i32, i32
  }
  func.func @transform_3(%arg0: i32, %arg1: i32) -> (i32, i32, i32) {
    %c0_i32 = arith.constant 0 : i32
    %c0_i32_0 = arith.constant 0 : i32
    return %arg0, %arg1, %c0_i32 : i32, i32, i32
  }
  func.func @transform_4(%arg0: i32, %arg1: i32) -> (i32, i32, i32) {
    %c0_i32 = arith.constant 0 : i32
    %c0_i32_0 = arith.constant 0 : i32
    return %arg0, %arg1, %c0_i32 : i32, i32, i32
  }
}

</mosaic_0001>

<bundles_post_ra>
// kernel: tpu_custom_call.1
= control target key start
LH: loop header
LB: loop body
LE: loop exit
PB: predicated region body
PF: predicated region fallthrough
CT: control target
= control target key end

     0   :  { %10 = vsyncpa [#allocation3], 0  ;;  %s2625_s0 = inlined_call_operand.hbm [shape: f32[2,256,128], index: 0, kind: input, shape index: {}]   ;;  %s2626_s1 = inlined_call_operand.hbm [shape: bf16[128,384], index: 1, kind: input, shape index: {}]   ;;  %s2627_s2 = inlined_call_operand.vmem [shape: f32[1,384], index: 2, kind: input, shape index: {}]   ;;  %s2628_s3 = inlined_call_operand.hbm [shape: bf16[2,256,128], index: 3, kind: output, shape index: {0}]   ;;  %s2629_s4 = inlined_call_operand.hbm [shape: bf16[2,256,256], index: 4, kind: output, shape index: {1}]  }
   0x1   :  { %12 = vsyncpa [#allocation3 + $0x1], 0 }
   0x2   :  { %13 = vsyncpa [#allocation6], 0 }
   0x3   :  { %14 = vsyncpa [#allocation4], 0 }
   0x4   :  { %16 = vsyncpa [#allocation4 + $0x1], 0 }
   0x5   :  { %17 = vsyncpa [#allocation9], 0 }
   0x6   :  { %19 = vsyncpa [#allocation9 + $0x1], 0  ;;  %s2095_s15 = smov 0   ;;  %s2097_s16 = smov 0  }
   0x7   :  { %s2099_s17 = smov 0   ;;  %s2101_s18 = smov 0  }
   0x8   :  { %s2103_s19 = smov 0   ;;  %s2105_s20 = smov 0  }
   0x9 LB: > { %s1401_s21 = sadd.s32 4294967295, %s2055_s20   ;;  %s1402_s22 = sadd.s32 4294967294, %s2055_s20   ;;  %s2055_s20 = sphi %s2105_s20, %s25_s20   ;;  %s2051_s19 = sphi %s2103_s19, %s2653_s19   ;;  %s2047_s18 = sphi %s2101_s18, %s2652_s18   ;;  %s2043_s17 = sphi %s2099_s17, %s2651_s17   ;;  %s2039_s16 = sphi %s2097_s16, %s2650_s16   ;;  %s2035_s15 = sphi %s2095_s15, %s2649_s15  }
   0xa   : > { %p59_p0 = scmp.ne.s32.totalorder %s2039_s16, %s2035_s15  ;;  %p2129_p1 = scmp.eq.s32.totalorder %s1401_s21, 0 }
   0xb   : > { %p2133_p2 = scmp.eq.s32.totalorder %s1401_s21, 1  ;;  %p133_p3 = scmp.eq.s32.totalorder %s1402_s22, 1 }
   0xc   : > { %s2634_s23 = scalar_select %p2129_p1, 1, 0 }
   0xd   : > { %s2635_s24 = scalar_select %p2133_p2, 1, 0 }
   0xe   : > { %p2139_p4 = por %p2129_p1, %p59_p0  ;;  %p1403_p5 = scmp.ge.s32.totalorder %s2055_s20, 1 }
   0xf   : > { %p2144_p6 = por %p133_p3, %p59_p0  ;;  %p168_p7 = scmp.lt.s32.totalorder %s2055_s20, 3 }
  0x10   : > { %s2636_s25 = scalar_select %p2139_p4, 1, 0 }
  0x11   : > { %s2637_s26 = scalar_select %p2144_p6, 1, 0 }
  0x12   : > { %p2149_p8 = pnand %p1403_p5, %p168_p7  ;;  %s2057_s28 = smov [#allocation5]  }
  0x13   : > { %s180_s29 = sshll.u32 %s2057_s28, 4  ;;  %s37_s5 = sadd.s32 1, %s2051_s19  ;;  %s181_s29 = int_to_ptr.vmem [resolvable:$true] %s180_s29 }
  0x14   : > { %s2638_s27 = scalar_select %p2149_p8, 1, 0 }
  0x15   : > { %p1770_p9 = pneg %p2149_p8  ;;  %s1879_s8 = scalar_lea.hbm %s2626_s1, 3072 }
  0x16   : > { %p1880_p12 = scmp.ne.s32.totalorder %s2626_s1, %s1879_s8  ;;  %p1886_p5 = scmp.lt.u32.totalorder %s1879_s8, %s2626_s1 }
  0x17   : > { %p2158_p11 = pnand %p1770_p9, %p2129_p1 }
  0x19   : > { %p1881_p13 = pneg %p2158_p11 }
  0x1b   : > { %p1882_p0 = pnand %p1881_p13, %p1880_p12 }
  0x1d   : > { %p1883_p3 = pneg %p1882_p0 }
  0x1f   : > { %p1888_p7 = pnand %p1886_p5, %p1883_p3 }
  0x21   : > { %1891 = shalt.err (!%p1888_p7)
}
  0x22   : > { %s1892_s13 = scalar_lea.vmem %s181_s29, 3072  ;;  %p1900_p1 = scmp.lt.s32.totalorder %s181_s29, %s181_s29 }
  0x23   : > { %p1893_p9 = scmp.ne.s32.totalorder %s181_s29, %s1892_s13  ;;  %p1901_p4 = scmp.lt.s32.totalorder %s1892_s13, %s1892_s13 }
  0x25   : > { %p1895_p10 = pnand %p1893_p9, %p1881_p13  ;;  %p1902_p8 = por %p1901_p4, %p1900_p1 }
  0x27   : > { %p1896_p6 = pneg %p1895_p10 }
  0x29   : > { %p1903_p2 = pnand %p1902_p8, %p1896_p6 }
  0x2b   : > { %1906 = shalt.err (!%p1903_p2)
}
  0x2c   : > { %s2058_s14 = smov 192   ;;  %s2059_s21 = smov 12  }
  0x2d   : > { %1773 = dma.hbm_to_vmem [thread:$0]  (!%p2158_p11), %s2626_s1, 3072, %s181_s29, [#allocation6], %s2058_s14, %s2058_s14, %s2059_s21  }
  0x2e   : > { %p39_p1 = scmp.ge.s32.totalorder %s37_s5, 2  ;;  %s46_s6 = sadd.s32 1, %s2043_s17 }
  0x2f   : > { %p53_p2 = scmp.ne.s32.totalorder %s2043_s17, %s2039_s16  ;;  %p54_p4 = scmp.eq.s32.totalorder %s2055_s20, 0 }
  0x30   : > { %s2655_s5 = smov (%p39_p1, %s37_s5), 0  ;;  %p2641_p8 = scmp.ne.s32.totalorder %s2635_s24, 0 }
  0x31   : > { %p2185_p6 = por %p54_p4, %p53_p2  ;;  %s41_s30 = ssub.s32 %s2051_s19, %s2655_s5 }
  0x32   : > { %p2191_p10 = por %p2641_p8, %p53_p2  ;;  %p1786_p12 = scmp.lt.s32.totalorder %s2055_s20, 2 }
  0x33   : > { %p44_p11 = scmp.eq.s32.totalorder %s41_s30, 0  ;;  %s197_s29 = sand.u32 1, %s2043_s17  }
  0x34   : > { %s1406_s9 = sshll.u32 %s197_s29, 8  ;;  %s1510_s11 = sshll.u32 %s2051_s19, 12 }
  0x35   : > { %s2200_s10 = scalar_select %p44_p11, %s2043_s17, %s46_s6  }
  0x36   : > { %s2206_s14 = scalar_lea.hbm %s2625_s0, %s1510_s11  ;;  %s201_s24 = scalar_lea.vmem [#allocation2], %s1406_s9 }
  0x37   : > { %s210_s21 = sshll.u32 %s201_s24, 4  ;;  %p2212_p13 = pnand %p1786_p12, %p2185_p6  ;;  %s2208_s21 = int_to_ptr.vmem [resolvable:$true] %s210_s21 }
  0x38   : > { %s2216_s28 = scalar_lea.sflag [#allocation3], %s197_s29  ;;  %s1907_s6 = scalar_lea.hbm %s2206_s14, 4096 }
  0x39   : > { %p1908_p0 = scmp.ne.s32.totalorder %s2206_s14, %s1907_s6  ;;  %p1909_p3 = pneg %p2212_p13 }
  0x3a   : > { %s1912_s7 = scalar_lea.hbm %s2625_s0, 8192  ;;  %p1913_p9 = scmp.lt.u32.totalorder %s2206_s14, %s2625_s0 }
  0x3b   : > { %p1910_p5 = pnand %p1909_p3, %p1908_p0  ;;  %p1914_p1 = scmp.lt.u32.totalorder %s1912_s7, %s1907_s6 }
  0x3c   : > { %p1916_p4 = scmp.lt.u32.totalorder %s1907_s6, %s2206_s14 }
  0x3d   : > { %p1911_p7 = pneg %p1910_p5  ;;  %p1915_p2 = por %p1914_p1, %p1913_p9 }
  0x3f   : > { %p1917_p6 = por %p1916_p4, %p1915_p2 }
  0x41   : > { %p1918_p8 = pnand %p1917_p6, %p1911_p7 }
  0x43   : > { %1921 = shalt.err (!%p1918_p8)
}
  0x44   : > { %s1922_s29 = scalar_lea.vmem %s2208_s21, 4096  ;;  %s2060_s13 = smov [#allocation2]  }
  0x45   : > { %p1923_p12 = scmp.ne.s32.totalorder %s2208_s21, %s1922_s29  ;;  %s1927_s24 = sshll.u32 %s2060_s13, 4  ;;  %s1928_s24 = int_to_ptr.vmem [resolvable:$false] %s1927_s24 }
  0x46   : > { %s1929_s30 = scalar_lea.vmem %s1928_s24, 8192  ;;  %p1930_p5 = scmp.lt.s32.totalorder %s2208_s21, %s1928_s24 }
  0x47   : > { %p1925_p11 = pnand %p1923_p12, %p1909_p3  ;;  %p1931_p9 = scmp.lt.s32.totalorder %s1929_s30, %s1922_s29 }
  0x49   : > { %p1926_p0 = pneg %p1925_p11  ;;  %p1932_p1 = por %p1931_p9, %p1930_p5 }
  0x4b   : > { %p1933_p2 = pnand %p1932_p1, %p1926_p0 }
  0x4d   : > { %1936 = shalt.err (!%p1933_p2)
}
  0x4e   : > { %s2061_s6 = smov 128   ;;  %s2062_s9 = smov 8  }
  0x4f   : > { %1777 = dma.hbm_to_vmem [thread:$0]  (!%p2212_p13), %s2206_s14, 4096, %s2208_s21, %s2216_s28, %s2061_s6, %s2061_s6, %s2062_s9  }
  0x50   : > { %p2644_p3 = scmp.ne.s32.totalorder %s2638_s27, 0 }
  0x51   : > { %s2247_s7 = sand.u32 (!%p2644_p3), 1, %s2039_s16   ;;  %p2645_p7 = scmp.ne.s32.totalorder (!%p2644_p3), %s2636_s25, 0 }
  0x52   : > { %222 = sbr.rel (%p2644_p3) target bundleno = 473 (0x1d9), region = 32  ;;  %s1410_s11 = sshll.u32 (!%p2644_p3), %s2247_s7, 8 }
  0x53   : > { %s225_s12 = scalar_lea.sflag (!%p2644_p3), [#allocation3], %s2247_s7  ;;  %s2253_s29 = scalar_lea.vmem (!%p2644_p3), [#allocation2], %s1410_s11 }
  0x59   : > { %2018 = dma.done.wait (%p2645_p7), %s225_s12, 4096  }
  0x5a   : > { %2020 = vsyncadd (%p2645_p7), %s225_s12, 4294963200  ;;  %p2646_p13 = scmp.ne.s32.totalorder %s2634_s23, 0 }
  0x5c   : > { %2022 = dma.done.wait (%p2646_p13), [#allocation6], 3072  }
  0x5d   : > { %2024 = vsyncadd (%p2646_p13), [#allocation6], 4294964224  ;;  %v2063_v0 = vmov 0   ;;  %v1847_v1 = vld [vmem:[#allocation5 + $0x4] ss:$12 sps:$4 sm:$0xff]   ;;  %v267_v18 = vld [vmem:[%s2253_s29 + $0x8] sm:$0xff] }
  0x5e   : > { %523 = vmatprep.mubr.bf16.mxu0 %v2063_v0  ;;  %643 = vmatprep.mubr.bf16.mxu1 %v2063_v0  ;;  %v1849_v2 = vld [vmem:[#allocation5] ss:$12 sps:$4 sm:$0xff]   ;;  %v1850_v3 = vld [vmem:[#allocation5 + $0x1c] ss:$12 sps:$4 sm:$0xff]   ;;  %v1852_v4 = vld [vmem:[#allocation5 + $0x18] ss:$12 sps:$4 sm:$0xff]  }
  0x5f   : > { %491 = vmatprep.subr.bf16.mxu0 %v1847_v1  ;;  %1744 = vmatprep.subr.bf16.mxu1 %v1847_v1  ;;  %v1853_v5 = vld [vmem:[#allocation5 + $0x34] ss:$12 sps:$4 sm:$0xff]   ;;  %v1855_v6 = vld [vmem:[#allocation5 + $0x30] ss:$12 sps:$4 sm:$0xff]   ;;  %v1856_v7 = vld [vmem:[#allocation5 + $0x4c] ss:$12 sps:$4 sm:$0xff]  }
  0x60   : > { %492 = vmatpush1.bf16.msra.mxu0 %v1849_v2  ;;  %1752 = vmatpush1.bf16.msra.mxu1 %v1849_v2  ;;  %v1858_v8 = vld [vmem:[#allocation5 + $0x48] ss:$12 sps:$4 sm:$0xff]   ;;  %v1859_v9 = vld [vmem:[#allocation5 + $0x64] ss:$12 sps:$4 sm:$0xff]   ;;  %v1861_v10 = vld [vmem:[#allocation5 + $0x60] ss:$12 sps:$4 sm:$0xff]  }
  0x61   : > { %493 = vmatprep.subr.bf16.mxu0 %v1850_v3  ;;  %1745 = vmatprep.subr.bf16.mxu1 %v1850_v3  ;;  %v1862_v11 = vld [vmem:[#allocation5 + $0x7c] ss:$12 sps:$4 sm:$0xff]   ;;  %v1864_v12 = vld [vmem:[#allocation5 + $0x78] ss:$12 sps:$4 sm:$0xff]   ;;  %v1865_v13 = vld [vmem:[#allocation5 + $0x94] ss:$12 sps:$4 sm:$0xff]  }
  0x62   : > { %v1867_v14 = vld [vmem:[#allocation5 + $0x90] ss:$12 sps:$4 sm:$0xff]   ;;  %v1868_v15 = vld [vmem:[#allocation5 + $0xac] ss:$12 sps:$4 sm:$0xff]   ;;  %v1870_v16 = vld [vmem:[#allocation5 + $0xa8] ss:$12 sps:$4 sm:$0xff]  }
  0x63   : > { %v266_v17 = vld [vmem:[%s2253_s29] sm:$0xff]  ;;  %v291_v20 = vld [vmem:[%s2253_s29 + $0xc8] sm:$0xff]  ;;  %v268_v25 = vld [vmem:[%s2253_s29 + $0x10] sm:$0xff]  ;;  %s1412_s27 = sshll.u32 %s2247_s7, 7  ;;  %s2411_s21 = scalar_lea.vmem [#allocation8], %s1410_s11 }
  0x64   : > { %494 = vmatpush1.bf16.msra.mxu0 %v1852_v4  ;;  %1753 = vmatpush1.bf16.msra.mxu1 %v1852_v4  ;;  %v290_v19 = vld [vmem:[%s2253_s29 + $0xc0] sm:$0xff]  ;;  %v1871_v21 = vld [vmem:[#allocation5 + $0x8] ss:$12 sps:$4 sm:$0xff]   ;;  %v298_v22 = vpack.c.bf16 %v267_v18, %v266_v17  ;;  %v269_v26 = vld [vmem:[%s2253_s29 + $0x18] sm:$0xff]  ;;  %s2351_s14 = scalar_lea.vmem [#allocation7], %s1412_s27  ;;  %s1575_s22 = sshll.u32 %s2047_s18, 11 }
  0x65   : > { %495 = vmatprep.subr.bf16.mxu0 %v1853_v5  ;;  %1746 = vmatprep.subr.bf16.mxu1 %v1853_v5  ;;  %v2269_v23 = vpack.c.bf16 %v291_v20, %v290_v19  ;;  %v1872_v24 = vld [vmem:[#allocation5 + $0x20] ss:$12 sps:$4 sm:$0xff]   ;;  %v292_v27 = vld [vmem:[%s2253_s29 + $0xd0] sm:$0xff]  ;;  %v293_v28 = vld [vmem:[%s2253_s29 + $0xd8] sm:$0xff]  ;;  %v299_v30 = vpack.c.bf16 %v269_v26, %v268_v25  ;;  %s1250_s28 = sshll.u32 %s2351_s14, 4  ;;  %s2524_s30 = scalar_lea.hbm %s2628_s3, %s1575_s22  ;;  %s2536_s28 = int_to_ptr.vmem [resolvable:$true] %s1250_s28 }
  0x66   : > { %v1873_v29 = vld [vmem:[#allocation5 + $0x38] ss:$12 sps:$4 sm:$0xff]   ;;  %v2278_v31 = vpack.c.bf16 %v293_v28, %v292_v27  ;;  %v1874_v32 = vld [vmem:[#allocation5 + $0x50] ss:$12 sps:$4 sm:$0xff]   ;;  %v271_v34 = vld [vmem:[%s2253_s29 + $0x28] sm:$0xff]  ;;  %s1576_s6 = sshll.u32 %s2047_s18, 12 }
  0x67   : > { %v270_v33 = vld [vmem:[%s2253_s29 + $0x20] sm:$0xff]  ;;  %v295_v36 = vld [vmem:[%s2253_s29 + $0xe8] sm:$0xff]  ;;  %v272_v41 = vld [vmem:[%s2253_s29 + $0x30] sm:$0xff]  ;;  %s1269_s9 = sshll.u32 %s2411_s21, 4  ;;  %s2544_s12 = scalar_lea.hbm %s2629_s4, %s1576_s6  ;;  %s2546_s9 = int_to_ptr.vmem [resolvable:$true] %s1269_s9 }
  0x68   : > { %496 = vmatpush1.bf16.msra.mxu0 %v1855_v6  ;;  %1754 = vmatpush1.bf16.msra.mxu1 %v1855_v6  ;;  %v294_v35 = vld [vmem:[%s2253_s29 + $0xe0] sm:$0xff]  ;;  %v1875_v37 = vld [vmem:[#allocation5 + $0x68] ss:$12 sps:$4 sm:$0xff]   ;;  %v300_v38 = vpack.c.bf16 %v271_v34, %v270_v33  ;;  %v273_v42 = vld [vmem:[%s2253_s29 + $0x38] sm:$0xff]  ;;  %s1937_s23 = scalar_lea.vmem %s2536_s28, 2048  ;;  %s2064_s25 = smov [#allocation7]  }
  0x69   : > { %497 = vmatprep.subr.bf16.mxu0 %v1856_v7  ;;  %1747 = vmatprep.subr.bf16.mxu1 %v1856_v7  ;;  %v2287_v39 = vpack.c.bf16 %v295_v36, %v294_v35  ;;  %v1876_v40 = vld [vmem:[#allocation5 + $0x80] ss:$12 sps:$4 sm:$0xff]   ;;  %v296_v43 = vld [vmem:[%s2253_s29 + $0xf0] sm:$0xff]  ;;  %v297_v44 = vld [vmem:[%s2253_s29 + $0xf8] sm:$0xff]  ;;  %v301_v46 = vpack.c.bf16 %v273_v42, %v272_v41  ;;  %p1938_p4 = scmp.ne.s32.totalorder %s2536_s28, %s1937_s23  ;;  %s1941_s27 = sshll.u32 %s2064_s25, 4  ;;  %s1942_s27 = int_to_ptr.vmem [resolvable:$false] %s1941_s27 }
  0x6a   : > { %v1877_v45 = vld [vmem:[#allocation5 + $0x98] ss:$12 sps:$4 sm:$0xff]   ;;  %v2296_v47 = vpack.c.bf16 %v297_v44, %v296_v43  ;;  %v1878_v48 = vld [vmem:[#allocation5 + $0xb0] ss:$12 sps:$4 sm:$0xff]   ;;  %v275_v50 = vld [vmem:[%s2253_s29 + $0x48] sm:$0xff]  ;;  %s1943_s22 = scalar_lea.vmem %s1942_s27, 4096  ;;  %p1944_p12 = scmp.lt.s32.totalorder %s2536_s28, %s1942_s27 }
  0x6b   : > { %v274_v49 = vld [vmem:[%s2253_s29 + $0x40] sm:$0xff]  ;;  %v276_v52 = vld [vmem:[%s2253_s29 + $0x50] sm:$0xff]  ;;  %v277_v53 = vld [vmem:[%s2253_s29 + $0x58] sm:$0xff]  ;;  %p1939_p6 = pnand %p1938_p4, %p2191_p10  ;;  %p1945_p11 = scmp.lt.s32.totalorder %s1943_s22, %s1937_s23 }
  0x6c   : > { %498 = vmatpush1.bf16.msra.mxu0 %v1858_v8  ;;  %1755 = vmatpush1.bf16.msra.mxu1 %v1858_v8  ;;  %v302_v51 = vpack.c.bf16 %v275_v50, %v274_v49  ;;  %v303_v54 = vpack.c.bf16 %v277_v53, %v276_v52  ;;  %v278_v55 = vld [vmem:[%s2253_s29 + $0x60] sm:$0xff]  ;;  %v279_v56 = vld [vmem:[%s2253_s29 + $0x68] sm:$0xff]  ;;  %v280_v58 = vld [vmem:[%s2253_s29 + $0x70] sm:$0xff] }
  0x6d   : > { %499 = vmatprep.subr.bf16.mxu0 %v1859_v9  ;;  %1748 = vmatprep.subr.bf16.mxu1 %v1859_v9  ;;  %v304_v57 = vpack.c.bf16 %v279_v56, %v278_v55  ;;  %v281_v59 = vld [vmem:[%s2253_s29 + $0x78] sm:$0xff]  ;;  %v282_v60 = vld [vmem:[%s2253_s29 + $0x80] sm:$0xff]  ;;  %v283_v61 = vld [vmem:[%s2253_s29 + $0x88] sm:$0xff]  ;;  %p1940_p8 = pneg %p1939_p6  ;;  %p1946_p0 = por %p1945_p11, %p1944_p12 }
  0x6e   : > { %v305_v62 = vpack.c.bf16 %v281_v59, %v280_v58  ;;  %v306_v63 = vpack.c.bf16 %v283_v61, %v282_v60  ;;  %v284_v1 = vld [vmem:[%s2253_s29 + $0x90] sm:$0xff]  ;;  %v285_v2 = vld [vmem:[%s2253_s29 + $0x98] sm:$0xff]  ;;  %v286_v3 = vld [vmem:[%s2253_s29 + $0xa0] sm:$0xff] }
  0x6f   : > { %v287_v4 = vld [vmem:[%s2253_s29 + $0xa8] sm:$0xff]  ;;  %v307_v5 = vpack.c.bf16 %v285_v2, %v284_v1  ;;  %v288_v7 = vld [vmem:[%s2253_s29 + $0xb0] sm:$0xff]  ;;  %v289_v8 = vld [vmem:[%s2253_s29 + $0xb8] sm:$0xff]  ;;  %s1230_s29 = scalar_lea.sflag [#allocation4], %s2247_s7  ;;  %p1947_p5 = pnand %p1946_p0, %p1940_p8 }
  0x70   : > { %500 = vmatpush1.bf16.msra.mxu0 %v1861_v10  ;;  %1756 = vmatpush1.bf16.msra.mxu1 %v1861_v10  ;;  %v308_v6 = vpack.c.bf16 %v287_v4, %v286_v3  ;;  %v309_v9 = vpack.c.bf16 %v289_v8, %v288_v7  ;;  %v348_v10 = vlaneseq }
  0x71   : > { %501 = vmatprep.subr.bf16.mxu0 %v1862_v11  ;;  %1749 = vmatprep.subr.bf16.mxu1 %v1862_v11 }
  0x72   : > { %v2327_v11 = vshrl.u32 %v348_v10, 7 }
  0x74   : > { %502 = vmatpush1.bf16.msra.mxu0 %v1864_v12  ;;  %1757 = vmatpush1.bf16.msra.mxu1 %v1864_v12  ;;  %v350_v12 = vsub.s32 0, %v2327_v11  ;;  %v358_v60 = vsub.s32 2, %v2327_v11  ;;  %v354_v61 = vsub.s32 1, %v2327_v11 }
  0x75   : > { %503 = vmatprep.subr.bf16.mxu0 %v1865_v13  ;;  %1750 = vmatprep.subr.bf16.mxu1 %v1865_v13  ;;  %v2333_v13 = vld [vmem:[%s2627_s2] sm:$0x7] }
  0x76   : > { %v2393_v10 = vrot.slane %v2333_v13, %v354_v61 }
  0x78   : > { %504 = vmatpush1.bf16.msra.mxu0 %v1867_v14  ;;  %1758 = vmatpush1.bf16.msra.mxu1 %v1867_v14  ;;  %v2336_v14 = vrot.slane %v2333_v13, %v350_v12 }
  0x79   : > { %505 = vmatprep.subr.bf16.mxu0 %v1868_v15  ;;  %1751 = vmatprep.subr.bf16.mxu1 %v1868_v15 }
  0x7c   : > { %506 = vmatpush1.bf16.msra.mxu0 %v1870_v16  ;;  %1759 = vmatpush1.bf16.msra.mxu1 %v1870_v16 }
  0x7d   : > { %1696 = vmatprep.subr.bf16.mxu1 %v1871_v21 }
  0x7f   : > { %524 = vmatmul.mubr.bf16.vlgmr.msra.gmra.mrb[0].mxu0 %v298_v22  ;;  %644 = vmatmul.mubr.bf16.vlgmr.msra.gmra.mrb[0].mxu1 %v2269_v23 }
  0x80   : > { %1697 = vmatpush3.bf16.msra.mxu1 %v1871_v21  ;;  %533 = vmatprep.mubr.bf16.mxu0 %v2063_v0 }
  0x81   : > { %1698 = vmatprep.subr.bf16.mxu1 %v1872_v24  ;;  %653 = vmatprep.mubr.bf16.mxu1 %v2063_v0 }
  0x84   : > { %1699 = vmatpush3.bf16.msra.mxu1 %v1872_v24 }
  0x85   : > { %1700 = vmatprep.subr.bf16.mxu1 %v1873_v29 }
  0x87   : > { %534 = vmatmul.mubr.bf16.gmra.mrb[4].mxu0 %v299_v30  ;;  %654 = vmatmul.mubr.bf16.gmra.mrb[4].mxu1 %v2278_v31 }
  0x88   : > { %1701 = vmatpush3.bf16.msra.mxu1 %v1873_v29  ;;  %543 = vmatprep.mubr.bf16.mxu0 %v2063_v0 }
  0x89   : > { %1702 = vmatprep.subr.bf16.mxu1 %v1874_v32  ;;  %663 = vmatprep.mubr.bf16.mxu1 %v2063_v0 }
  0x8c   : > { %1703 = vmatpush3.bf16.msra.mxu1 %v1874_v32 }
  0x8d   : > { %1704 = vmatprep.subr.bf16.mxu1 %v1875_v37 }
  0x8f   : > { %544 = vmatmul.mubr.bf16.gmra.mrb[8].mxu0 %v300_v38  ;;  %664 = vmatmul.mubr.bf16.gmra.mrb[8].mxu1 %v2287_v39 }
  0x90   : > { %1705 = vmatpush3.bf16.msra.mxu1 %v1875_v37  ;;  %553 = vmatprep.mubr.bf16.mxu0 %v2063_v0 }
  0x91   : > { %1706 = vmatprep.subr.bf16.mxu1 %v1876_v40  ;;  %673 = vmatprep.mubr.bf16.mxu1 %v2063_v0 }
  0x94   : > { %1707 = vmatpush3.bf16.msra.mxu1 %v1876_v40 }
  0x95   : > { %1708 = vmatprep.subr.bf16.mxu1 %v1877_v45 }
  0x97   : > { %554 = vmatmul.mubr.bf16.gmra.mrb[12].mxu0 %v301_v46  ;;  %674 = vmatmul.mubr.bf16.gmra.mrb[12].mxu1 %v2296_v47 }
  0x98   : > { %1709 = vmatpush3.bf16.msra.mxu1 %v1877_v45  ;;  %563 = vmatprep.mubr.bf16.mxu0 %v2063_v0 }
  0x99   : > { %1710 = vmatprep.subr.bf16.mxu1 %v1878_v48  ;;  %1712 = vmatprep.mubr.bf16.mxu1 %v298_v22 }
  0x9c   : > { %1711 = vmatpush3.bf16.msra.mxu1 %v1878_v48 }
  0x9f   : > { %564 = vmatmul.mubr.bf16.gmra.mrb[16].mxu0 %v302_v51  ;;  %1713 = vmatmul.mubr.bf16.vlgmr.msra.gmra.mrb[16].mxu1 %v299_v30 }
  0xa0   : > { %573 = vmatprep.mubr.bf16.mxu0 %v2063_v0  ;;  %1716 = vmatprep.mubr.bf16.mxu1 %v300_v38 }
  0xa7   : > { %574 = vmatmul.mubr.bf16.gmra.mrb[20].mxu0 %v303_v54  ;;  %1717 = vmatmul.mubr.bf16.gmra.mrb[20].mxu1 %v301_v46 }
  0xa8   : > { %583 = vmatprep.mubr.bf16.mxu0 %v2063_v0  ;;  %1720 = vmatprep.mubr.bf16.mxu1 %v302_v51 }
  0xaf   : > { %584 = vmatmul.mubr.bf16.gmra.mrb[24].mxu0 %v304_v57  ;;  %1721 = vmatmul.mubr.bf16.gmra.mrb[24].mxu1 %v303_v54 }
  0xb0   : > { %593 = vmatprep.mubr.bf16.mxu0 %v2063_v0  ;;  %1724 = vmatprep.mubr.bf16.mxu1 %v304_v57 }
  0xb7   : > { %594 = vmatmul.mubr.bf16.gmra.mrb[28].mxu0 %v305_v62  ;;  %1725 = vmatmul.mubr.bf16.gmra.mrb[28].mxu1 %v305_v62 }
  0xb8   : > { %603 = vmatprep.mubr.bf16.mxu0 %v2063_v0  ;;  %1728 = vmatprep.mubr.bf16.mxu1 %v306_v63 }
  0xbf   : > { %604 = vmatmul.mubr.bf16.gmra.mrb[32].mxu0 %v306_v63  ;;  %1729 = vmatmul.mubr.bf16.gmra.mrb[32].mxu1 %v307_v5 }
  0xc0   : > { %613 = vmatprep.mubr.bf16.mxu0 %v2063_v0  ;;  %1732 = vmatprep.mubr.bf16.mxu1 %v308_v6 }
  0xc7   : > { %614 = vmatmul.mubr.bf16.gmra.mrb[36].mxu0 %v307_v5  ;;  %1733 = vmatmul.mubr.bf16.gmra.mrb[36].mxu1 %v309_v9 }
  0xc8   : > { %623 = vmatprep.mubr.bf16.mxu0 %v2063_v0  ;;  %1736 = vmatprep.mubr.bf16.mxu1 %v2269_v23 }
  0xcf   : > { %624 = vmatmul.mubr.bf16.gmra.mrb[40].mxu0 %v308_v6  ;;  %1737 = vmatmul.mubr.bf16.gmra.mrb[40].mxu1 %v2278_v31 }
  0xd0   : > { %633 = vmatprep.mubr.bf16.mxu0 %v2063_v0  ;;  %1740 = vmatprep.mubr.bf16.mxu1 %v2287_v39 }
  0xd7   : > { %634 = vmatmul.mubr.bf16.gmra.mrb[44].mxu0 %v309_v9  ;;  %1741 = vmatmul.mubr.bf16.gmra.mrb[44].mxu1 %v2296_v47  ;;  %v2390_v9 = vrot.slane %v2333_v13, %v358_v60 }
 0x152   : > { %v525_v15 = vpop.f32.mrb[0].mxu0  ;;  %v645_v0 = vpop.f32.mrb[0].mxu1 }
 0x153   : > { %v2338_v16 = vpop.f32.mrb[1].mxu0  ;;  %v2340_v17 = vpop.f32.mrb[1].mxu1  ;;  %v526_v20 = vadd.f32 %v525_v15, %v2336_v14  ;;  %v646_v21 = vadd.f32 %v645_v0, %v2336_v14 }
 0x154   : > { %v529_v18 = vpop.f32.mrb[2].mxu0  ;;  %v649_v19 = vpop.f32.mrb[2].mxu1 }
 0x155   : > { %v530_v22 = vadd.f32 %v529_v18, %v2336_v14  ;;  %v650_v23 = vadd.f32 %v649_v19, %v2336_v14  ;;  %v2347_v24 = vpop.f32.mrb[3].mxu0  ;;  %v2349_v25 = vpop.f32.mrb[3].mxu1 }
 0x157   : > { %v1580_v26 = vpack.c.bf16 %v530_v22, %v526_v20  ;;  %v1640_v27 = vpack.c.bf16 %v650_v23, %v646_v21  ;;  %v528_v20 = vadd.f32 %v2338_v16, %v2393_v10 }
 0x159   : > { %1581 = vst [vmem:[%s2351_s14] sm:$0xff] %v1580_v26   ;;  %1668 = vst [vmem:[%s2351_s14 + $0x60] sm:$0xff] %v1640_v27  }
 0x15a   : > { %v535_v28 = vpop.f32.mrb[4].mxu0  ;;  %v655_v29 = vpop.f32.mrb[4].mxu1 }
 0x15b   : > { %v537_v30 = vpop.f32.mrb[5].mxu0  ;;  %v2355_v31 = vpop.f32.mrb[5].mxu1  ;;  %v536_v34 = vadd.f32 %v535_v28, %v2336_v14  ;;  %v656_v35 = vadd.f32 %v655_v29, %v2336_v14 }
 0x15c   : > { %v539_v32 = vpop.f32.mrb[6].mxu0  ;;  %v659_v33 = vpop.f32.mrb[6].mxu1  ;;  %v538_v15 = vadd.f32 %v537_v30, %v2393_v10 }
 0x15d   : > { %v540_v36 = vadd.f32 %v539_v32, %v2336_v14  ;;  %v660_v37 = vadd.f32 %v659_v33, %v2336_v14  ;;  %v541_v38 = vpop.f32.mrb[7].mxu0  ;;  %v2361_v39 = vpop.f32.mrb[7].mxu1  ;;  %v532_v33 = vadd.f32 %v2347_v24, %v2393_v10 }
 0x15e   : > { %v542_v21 = vadd.f32 %v541_v38, %v2393_v10 }
 0x15f   : > { %v1585_v40 = vpack.c.bf16 %v540_v36, %v536_v34  ;;  %v1645_v41 = vpack.c.bf16 %v660_v37, %v656_v35 }
 0x161   : > { %1657 = vst [vmem:[%s2351_s14 + $0x8] sm:$0xff] %v1585_v40   ;;  %1669 = vst [vmem:[%s2351_s14 + $0x68] sm:$0xff] %v1645_v41  }
 0x162   : > { %v545_v42 = vpop.f32.mrb[8].mxu0  ;;  %v665_v43 = vpop.f32.mrb[8].mxu1 }
 0x163   : > { %v2365_v44 = vpop.f32.mrb[9].mxu0  ;;  %v2367_v45 = vpop.f32.mrb[9].mxu1  ;;  %v546_v48 = vadd.f32 %v545_v42, %v2336_v14  ;;  %v666_v49 = vadd.f32 %v665_v43, %v2336_v14 }
 0x164   : > { %v549_v46 = vpop.f32.mrb[10].mxu0  ;;  %v669_v47 = vpop.f32.mrb[10].mxu1 }
 0x165   : > { %v550_v50 = vadd.f32 %v549_v46, %v2336_v14  ;;  %v670_v51 = vadd.f32 %v669_v47, %v2336_v14  ;;  %v2373_v52 = vpop.f32.mrb[11].mxu0  ;;  %v2375_v53 = vpop.f32.mrb[11].mxu1  ;;  %v548_v46 = vadd.f32 %v2365_v44, %v2393_v10 }
 0x166   : > { %v552_v44 = vadd.f32 %v2373_v52, %v2393_v10 }
 0x167   : > { %v1590_v54 = vpack.c.bf16 %v550_v50, %v546_v48  ;;  %v1650_v55 = vpack.c.bf16 %v670_v51, %v666_v49 }
 0x169   : > { %1658 = vst [vmem:[%s2351_s14 + $0x10] sm:$0xff] %v1590_v54   ;;  %1670 = vst [vmem:[%s2351_s14 + $0x70] sm:$0xff] %v1650_v55  }
 0x16a   : > { %v555_v56 = vpop.f32.mrb[12].mxu0  ;;  %v675_v57 = vpop.f32.mrb[12].mxu1 }
 0x16b   : > { %v557_v58 = vpop.f32.mrb[13].mxu0  ;;  %v2379_v59 = vpop.f32.mrb[13].mxu1  ;;  %v556_v1 = vadd.f32 %v555_v56, %v2336_v14  ;;  %v676_v2 = vadd.f32 %v675_v57, %v2336_v14 }
 0x16c   : > { %v559_v62 = vpop.f32.mrb[14].mxu0  ;;  %v679_v63 = vpop.f32.mrb[14].mxu1  ;;  %v558_v40 = vadd.f32 %v557_v58, %v2393_v10 }
 0x16d   : > { %v560_v3 = vadd.f32 %v559_v62, %v2336_v14  ;;  %v680_v4 = vadd.f32 %v679_v63, %v2336_v14  ;;  %v561_v5 = vpop.f32.mrb[15].mxu0  ;;  %v2387_v6 = vpop.f32.mrb[15].mxu1 }
 0x16e   : > { %v562_v47 = vadd.f32 %v561_v5, %v2393_v10 }
 0x16f   : > { %v1595_v7 = vpack.c.bf16 %v560_v3, %v556_v1  ;;  %v1655_v8 = vpack.c.bf16 %v680_v4, %v676_v2 }
 0x171   : > { %1659 = vst [vmem:[%s2351_s14 + $0x18] sm:$0xff] %v1595_v7   ;;  %1671 = vst [vmem:[%s2351_s14 + $0x78] sm:$0xff] %v1655_v8  }
 0x172   : > { %v565_v11 = vpop.f32.mrb[16].mxu0  ;;  %v1714_v12 = vpop.f32.mrb[16].mxu1 }
 0x173   : > { %v727_v0 = vadd.f32 %v1714_v12, %v2390_v9  ;;  %v567_v18 = vpop.f32.mrb[17].mxu0  ;;  %v718_v19 = vpop.f32.mrb[17].mxu1  ;;  %v566_v26 = vadd.f32 %v565_v11, %v2336_v14 }
 0x174   : > { %v719_v22 = vadd.f32 %v718_v19, %v2390_v9  ;;  %v569_v13 = vpop.f32.mrb[18].mxu0  ;;  %v1715_v23 = vpop.f32.mrb[18].mxu1  ;;  %v568_v8 = vadd.f32 %v567_v18, %v2393_v10 }
 0x175   : > { %v1545_v27 = vpack.c.bf16 %v727_v0, %v538_v15  ;;  %v570_v28 = vadd.f32 %v569_v13, %v2336_v14  ;;  %v730_v29 = vadd.f32 %v1715_v23, %v2390_v9  ;;  %v571_v30 = vpop.f32.mrb[19].mxu0  ;;  %v721_v32 = vpop.f32.mrb[19].mxu1 }
 0x176   : > { %v1543_v16 = vpack.c.bf16 %v719_v22, %v528_v20  ;;  %v722_v34 = vadd.f32 %v721_v32, %v2390_v9  ;;  %v572_v18 = vadd.f32 %v571_v30, %v2393_v10 }
 0x177   : > { %1199 = vst [vmem:[%s2411_s21 + $0x10] sm:$0xff] %v1545_v27  ;;  %v1600_v35 = vpack.c.bf16 %v570_v28, %v566_v26  ;;  %v1546_v36 = vpack.c.bf16 %v730_v29, %v542_v21 }
 0x178   : > { %1197 = vst [vmem:[%s2411_s21] sm:$0xff] %v1543_v16  ;;  %v1544_v37 = vpack.c.bf16 %v722_v34, %v532_v33 }
 0x179   : > { %1660 = vst [vmem:[%s2351_s14 + $0x20] sm:$0xff] %v1600_v35   ;;  %1200 = vst [vmem:[%s2411_s21 + $0x18] sm:$0xff] %v1546_v36 }
 0x17a   : > { %1198 = vst [vmem:[%s2411_s21 + $0x8] sm:$0xff] %v1544_v37  ;;  %v575_v38 = vpop.f32.mrb[20].mxu0  ;;  %v1718_v24 = vpop.f32.mrb[20].mxu1 }
 0x17b   : > { %v743_v41 = vadd.f32 %v1718_v24, %v2390_v9  ;;  %v577_v42 = vpop.f32.mrb[21].mxu0  ;;  %v734_v43 = vpop.f32.mrb[21].mxu1  ;;  %v576_v51 = vadd.f32 %v575_v38, %v2336_v14 }
 0x17c   : > { %v735_v48 = vadd.f32 %v734_v43, %v2390_v9  ;;  %v579_v49 = vpop.f32.mrb[22].mxu0  ;;  %v1719_v50 = vpop.f32.mrb[22].mxu1  ;;  %v578_v4 = vadd.f32 %v577_v42, %v2393_v10 }
 0x17d   : > { %v1549_v54 = vpack.c.bf16 %v743_v41, %v558_v40  ;;  %v580_v55 = vadd.f32 %v579_v49, %v2336_v14  ;;  %v746_v56 = vadd.f32 %v1719_v50, %v2390_v9  ;;  %v581_v57 = vpop.f32.mrb[23].mxu0  ;;  %v737_v58 = vpop.f32.mrb[23].mxu1 }
 0x17e   : > { %v1547_v60 = vpack.c.bf16 %v735_v48, %v548_v46  ;;  %v738_v61 = vadd.f32 %v737_v58, %v2390_v9  ;;  %v582_v11 = vadd.f32 %v581_v57, %v2393_v10 }
 0x17f   : > { %1203 = vst [vmem:[%s2411_s21 + $0x30] sm:$0xff] %v1549_v54  ;;  %v1605_v62 = vpack.c.bf16 %v580_v55, %v576_v51  ;;  %v1550_v63 = vpack.c.bf16 %v746_v56, %v562_v47 }
 0x180   : > { %1201 = vst [vmem:[%s2411_s21 + $0x20] sm:$0xff] %v1547_v60  ;;  %v1548_v1 = vpack.c.bf16 %v738_v61, %v552_v44 }
 0x181   : > { %1661 = vst [vmem:[%s2351_s14 + $0x28] sm:$0xff] %v1605_v62   ;;  %1204 = vst [vmem:[%s2411_s21 + $0x38] sm:$0xff] %v1550_v63 }
 0x182   : > { %1202 = vst [vmem:[%s2411_s21 + $0x28] sm:$0xff] %v1548_v1  ;;  %v585_v2 = vpop.f32.mrb[24].mxu0  ;;  %v1722_v3 = vpop.f32.mrb[24].mxu1 }
 0x183   : > { %v759_v5 = vadd.f32 %v1722_v3, %v2390_v9  ;;  %v587_v7 = vpop.f32.mrb[25].mxu0  ;;  %v750_v52 = vpop.f32.mrb[25].mxu1  ;;  %v586_v19 = vadd.f32 %v585_v2, %v2336_v14 }
 0x184   : > { %v751_v12 = vadd.f32 %v750_v52, %v2390_v9  ;;  %v589_v15 = vpop.f32.mrb[26].mxu0  ;;  %v1723_v0 = vpop.f32.mrb[26].mxu1  ;;  %v588_v37 = vadd.f32 %v587_v7, %v2393_v10 }
 0x185   : > { %v1553_v20 = vpack.c.bf16 %v759_v5, %v578_v4  ;;  %v590_v21 = vadd.f32 %v589_v15, %v2336_v14  ;;  %v762_v22 = vadd.f32 %v1723_v0, %v2390_v9  ;;  %v591_v13 = vpop.f32.mrb[27].mxu0  ;;  %v753_v23 = vpop.f32.mrb[27].mxu1 }
 0x186   : > { %v1551_v26 = vpack.c.bf16 %v751_v12, %v568_v8  ;;  %v754_v27 = vadd.f32 %v753_v23, %v2390_v9  ;;  %v592_v41 = vadd.f32 %v591_v13, %v2393_v10 }
 0x187   : > { %1207 = vst [vmem:[%s2411_s21 + $0x50] sm:$0xff] %v1553_v20  ;;  %v1610_v28 = vpack.c.bf16 %v590_v21, %v586_v19  ;;  %v1554_v29 = vpack.c.bf16 %v762_v22, %v582_v11 }
 0x188   : > { %1205 = vst [vmem:[%s2411_s21 + $0x40] sm:$0xff] %v1551_v26  ;;  %v1552_v32 = vpack.c.bf16 %v754_v27, %v572_v18 }
 0x189   : > { %1662 = vst [vmem:[%s2351_s14 + $0x30] sm:$0xff] %v1610_v28   ;;  %1208 = vst [vmem:[%s2411_s21 + $0x58] sm:$0xff] %v1554_v29 }
 0x18a   : > { %1206 = vst [vmem:[%s2411_s21 + $0x48] sm:$0xff] %v1552_v32  ;;  %v595_v33 = vpop.f32.mrb[28].mxu0  ;;  %v1726_v16 = vpop.f32.mrb[28].mxu1 }
 0x18b   : > { %v775_v34 = vadd.f32 %v1726_v16, %v2390_v9  ;;  %v597_v35 = vpop.f32.mrb[29].mxu0  ;;  %v766_v36 = vpop.f32.mrb[29].mxu1  ;;  %v596_v42 = vadd.f32 %v595_v33, %v2336_v14 }
 0x18c   : > { %v598_v30 = vadd.f32 %v597_v35, %v2393_v10  ;;  %v767_v38 = vadd.f32 %v766_v36, %v2390_v9  ;;  %v599_v24 = vpop.f32.mrb[30].mxu0  ;;  %v1727_v40 = vpop.f32.mrb[30].mxu1  ;;  %v648_v36 = vadd.f32 %v2340_v17, %v2393_v10 }
 0x18d   : > { %v600_v43 = vadd.f32 %v599_v24, %v2336_v14  ;;  %v778_v46 = vadd.f32 %v1727_v40, %v2390_v9  ;;  %v601_v47 = vpop.f32.mrb[31].mxu0  ;;  %v769_v48 = vpop.f32.mrb[31].mxu1  ;;  %v658_v24 = vadd.f32 %v2355_v31, %v2393_v10  ;;  %v662_v40 = vadd.f32 %v2361_v39, %v2393_v10 }
 0x18e   : > { %v1557_v49 = vpack.c.bf16 %v775_v34, %v598_v30  ;;  %v1555_v50 = vpack.c.bf16 %v767_v38, %v588_v37  ;;  %v602_v51 = vadd.f32 %v601_v47, %v2393_v10  ;;  %v770_v54 = vadd.f32 %v769_v48, %v2390_v9 }
 0x18f   : > { %v1615_v55 = vpack.c.bf16 %v600_v43, %v596_v42  ;;  %v652_v38 = vadd.f32 %v2349_v25, %v2393_v10 }
 0x190   : > { %1211 = vst [vmem:[%s2411_s21 + $0x70] sm:$0xff] %v1557_v49  ;;  %1209 = vst [vmem:[%s2411_s21 + $0x60] sm:$0xff] %v1555_v50  ;;  %v1558_v56 = vpack.c.bf16 %v778_v46, %v602_v51  ;;  %v1556_v57 = vpack.c.bf16 %v770_v54, %v592_v41 }
 0x191   : > { %1663 = vst [vmem:[%s2351_s14 + $0x38] sm:$0xff] %v1615_v55  }
 0x192   : > { %1212 = vst [vmem:[%s2411_s21 + $0x78] sm:$0xff] %v1558_v56  ;;  %1210 = vst [vmem:[%s2411_s21 + $0x68] sm:$0xff] %v1556_v57  ;;  %v605_v58 = vpop.f32.mrb[32].mxu0  ;;  %v1730_v44 = vpop.f32.mrb[32].mxu1 }
 0x193   : > { %v607_v60 = vpop.f32.mrb[33].mxu0  ;;  %v782_v61 = vpop.f32.mrb[33].mxu1  ;;  %v606_v3 = vadd.f32 %v605_v58, %v2336_v14  ;;  %v791_v22 = vadd.f32 %v1730_v44, %v2390_v9 }
 0x194   : > { %v608_v62 = vadd.f32 %v607_v60, %v2393_v10  ;;  %v783_v63 = vadd.f32 %v782_v61, %v2390_v9  ;;  %v609_v1 = vpop.f32.mrb[34].mxu0  ;;  %v1731_v2 = vpop.f32.mrb[34].mxu1 }
 0x195   : > { %v610_v4 = vadd.f32 %v609_v1, %v2336_v14  ;;  %v611_v5 = vpop.f32.mrb[35].mxu0  ;;  %v785_v7 = vpop.f32.mrb[35].mxu1  ;;  %v794_v32 = vadd.f32 %v1731_v2, %v2390_v9  ;;  %v668_v1 = vadd.f32 %v2367_v45, %v2393_v10 }
 0x196   : > { %v1559_v52 = vpack.c.bf16 %v783_v63, %v608_v62  ;;  %v612_v8 = vadd.f32 %v611_v5, %v2393_v10  ;;  %v786_v11 = vadd.f32 %v785_v7, %v2390_v9  ;;  %v678_v5 = vadd.f32 %v2379_v59, %v2393_v10 }
 0x197   : > { %v1620_v12 = vpack.c.bf16 %v610_v4, %v606_v3  ;;  %v672_v4 = vadd.f32 %v2375_v53, %v2393_v10  ;;  %v682_v7 = vadd.f32 %v2387_v6, %v2393_v10 }
 0x198   : > { %1213 = vst [vmem:[%s2411_s21 + $0x80] sm:$0xff] %v1559_v52  ;;  %v1560_v15 = vpack.c.bf16 %v786_v11, %v612_v8 }
 0x199   : > { %1664 = vst [vmem:[%s2351_s14 + $0x40] sm:$0xff] %v1620_v12  }
 0x19a   : > { %1214 = vst [vmem:[%s2411_s21 + $0x88] sm:$0xff] %v1560_v15  ;;  %v615_v0 = vpop.f32.mrb[36].mxu0  ;;  %v2474_v19 = vpop.f32.mrb[36].mxu1 }
 0x19b   : > { %v617_v20 = vpop.f32.mrb[37].mxu0  ;;  %v798_v21 = vpop.f32.mrb[37].mxu1  ;;  %v616_v26 = vadd.f32 %v615_v0, %v2336_v14  ;;  %v807_v11 = vadd.f32 %v2474_v19, %v2390_v9 }
 0x19c   : > { %v618_v13 = vadd.f32 %v617_v20, %v2393_v10  ;;  %v619_v23 = vpop.f32.mrb[38].mxu0  ;;  %v1735_v18 = vpop.f32.mrb[38].mxu1  ;;  %v799_v46 = vadd.f32 %v798_v21, %v2390_v9 }
 0x19d   : > { %v620_v27 = vadd.f32 %v619_v23, %v2336_v14  ;;  %v621_v28 = vpop.f32.mrb[39].mxu0  ;;  %v801_v29 = vpop.f32.mrb[39].mxu1  ;;  %v810_v53 = vadd.f32 %v1735_v18, %v2390_v9 }
 0x19e   : > { %v1561_v33 = vpack.c.bf16 %v791_v22, %v618_v13  ;;  %v622_v16 = vadd.f32 %v621_v28, %v2393_v10  ;;  %v802_v17 = vadd.f32 %v801_v29, %v2390_v9 }
 0x19f   : > { %v1625_v34 = vpack.c.bf16 %v620_v27, %v616_v26 }
 0x1a0   : > { %1215 = vst [vmem:[%s2411_s21 + $0x90] sm:$0xff] %v1561_v33  ;;  %v1562_v35 = vpack.c.bf16 %v794_v32, %v622_v16 }
 0x1a1   : > { %1665 = vst [vmem:[%s2351_s14 + $0x48] sm:$0xff] %v1625_v34  }
 0x1a2   : > { %1216 = vst [vmem:[%s2411_s21 + $0x98] sm:$0xff] %v1562_v35  ;;  %v625_v37 = vpop.f32.mrb[40].mxu0  ;;  %v1738_v30 = vpop.f32.mrb[40].mxu1 }
 0x1a3   : > { %v823_v41 = vadd.f32 %v1738_v30, %v2390_v9  ;;  %v627_v42 = vpop.f32.mrb[41].mxu0  ;;  %v814_v43 = vpop.f32.mrb[41].mxu1  ;;  %v626_v49 = vadd.f32 %v625_v37, %v2336_v14 }
 0x1a4   : > { %v628_v47 = vadd.f32 %v627_v42, %v2393_v10  ;;  %v815_v48 = vadd.f32 %v814_v43, %v2390_v9  ;;  %v629_v25 = vpop.f32.mrb[42].mxu0  ;;  %v1739_v31 = vpop.f32.mrb[42].mxu1 }
 0x1a5   : > { %v1569_v39 = vpack.c.bf16 %v823_v41, %v658_v24  ;;  %v630_v50 = vadd.f32 %v629_v25, %v2336_v14  ;;  %v826_v51 = vadd.f32 %v1739_v31, %v2390_v9  ;;  %v631_v54 = vpop.f32.mrb[43].mxu0  ;;  %v817_v55 = vpop.f32.mrb[43].mxu1 }
 0x1a6   : > { %v1563_v56 = vpack.c.bf16 %v799_v46, %v628_v47  ;;  %v1567_v57 = vpack.c.bf16 %v815_v48, %v648_v36  ;;  %v632_v58 = vadd.f32 %v631_v54, %v2393_v10  ;;  %v818_v44 = vadd.f32 %v817_v55, %v2390_v9 }
 0x1a7   : > { %1223 = vst [vmem:[%s2411_s21 + $0xd0] sm:$0xff] %v1569_v39  ;;  %v1630_v60 = vpack.c.bf16 %v630_v50, %v626_v49  ;;  %v1570_v61 = vpack.c.bf16 %v826_v51, %v662_v40 }
 0x1a8   : > { %1217 = vst [vmem:[%s2411_s21 + $0xa0] sm:$0xff] %v1563_v56  ;;  %1221 = vst [vmem:[%s2411_s21 + $0xc0] sm:$0xff] %v1567_v57  ;;  %v1564_v62 = vpack.c.bf16 %v802_v17, %v632_v58  ;;  %v1568_v63 = vpack.c.bf16 %v818_v44, %v652_v38 }
 0x1a9   : > { %1666 = vst [vmem:[%s2351_s14 + $0x50] sm:$0xff] %v1630_v60   ;;  %1224 = vst [vmem:[%s2411_s21 + $0xd8] sm:$0xff] %v1570_v61 }
 0x1aa   : > { %1218 = vst [vmem:[%s2411_s21 + $0xa8] sm:$0xff] %v1564_v62  ;;  %1222 = vst [vmem:[%s2411_s21 + $0xc8] sm:$0xff] %v1568_v63  ;;  %v635_v2 = vpop.f32.mrb[44].mxu0  ;;  %v1742_v3 = vpop.f32.mrb[44].mxu1 }
 0x1ab   : > { %v839_v52 = vadd.f32 %v1742_v3, %v2390_v9  ;;  %v637_v8 = vpop.f32.mrb[45].mxu0  ;;  %v830_v45 = vpop.f32.mrb[45].mxu1  ;;  %v636_v0 = vadd.f32 %v635_v2, %v2336_v14 }
 0x1ac   : > { %v638_v12 = vadd.f32 %v637_v8, %v2393_v10  ;;  %v831_v59 = vadd.f32 %v830_v45, %v2390_v9  ;;  %v639_v6 = vpop.f32.mrb[46].mxu0  ;;  %v1743_v15 = vpop.f32.mrb[46].mxu1 }
 0x1ad   : > { %v1573_v20 = vpack.c.bf16 %v839_v52, %v678_v5  ;;  %v640_v21 = vadd.f32 %v639_v6, %v2336_v14  ;;  %v842_v19 = vadd.f32 %v1743_v15, %v2390_v9  ;;  %v641_v22 = vpop.f32.mrb[47].mxu0  ;;  %v833_v13 = vpop.f32.mrb[47].mxu1 }
 0x1ae   : > { %v1565_v23 = vpack.c.bf16 %v807_v11, %v638_v12  ;;  %v1571_v18 = vpack.c.bf16 %v831_v59, %v668_v1  ;;  %v642_v26 = vadd.f32 %v641_v22, %v2393_v10  ;;  %v834_v27 = vadd.f32 %v833_v13, %v2390_v9 }
 0x1af   : > { %1227 = vst [vmem:[%s2411_s21 + $0xf0] sm:$0xff] %v1573_v20  ;;  %v1635_v14 = vpack.c.bf16 %v640_v21, %v636_v0  ;;  %v1574_v28 = vpack.c.bf16 %v842_v19, %v682_v7 }
 0x1b0   : > { %1219 = vst [vmem:[%s2411_s21 + $0xb0] sm:$0xff] %v1565_v23  ;;  %1225 = vst [vmem:[%s2411_s21 + $0xe0] sm:$0xff] %v1571_v18  ;;  %v1566_v29 = vpack.c.bf16 %v810_v53, %v642_v26  ;;  %v1572_v10 = vpack.c.bf16 %v834_v27, %v672_v4 }
 0x1b1   : > { %1667 = vst [vmem:[%s2351_s14 + $0x58] sm:$0xff] %v1635_v14   ;;  %1228 = vst [vmem:[%s2411_s21 + $0xf8] sm:$0xff] %v1574_v28 }
 0x1b2   : > { %1220 = vst [vmem:[%s2411_s21 + $0xb8] sm:$0xff] %v1566_v29  ;;  %1226 = vst [vmem:[%s2411_s21 + $0xe8] sm:$0xff] %v1572_v10 }
 0x1b3   : > { %1950 = shalt.err (!%p1947_p5)
}
 0x1b4   : > { %s1951_s14 = scalar_lea.hbm %s2524_s30, 2048  ;;  %s1955_s24 = scalar_lea.hbm %s2628_s3, 4096 }
 0x1b5   : > { %p1952_p9 = scmp.ne.s32.totalorder %s2524_s30, %s1951_s14  ;;  %p1956_p3 = scmp.lt.u32.totalorder %s2524_s30, %s2628_s3 }
 0x1b6   : > { %p1957_p7 = scmp.lt.u32.totalorder %s1955_s24, %s1951_s14  ;;  %p1959_p4 = scmp.lt.u32.totalorder %s1951_s14, %s2524_s30 }
 0x1b7   : > { %p1953_p1 = pnand %p1952_p9, %p2191_p10 }
 0x1b8   : > { %p1958_p13 = por %p1957_p7, %p1956_p3 }
 0x1b9   : > { %p1954_p2 = pneg %p1953_p1 }
 0x1ba   : > { %p1960_p6 = por %p1959_p4, %p1958_p13 }
 0x1bc   : > { %p1961_p8 = pnand %p1960_p6, %p1954_p2 }
 0x1be   : > { %1964 = shalt.err (!%p1961_p8)
}
 0x1bf   : > { %s2065_s11 = smov 64   ;;  %s2066_s23 = smov 4  }
 0x1c0   : > { %1766 = dma.vmem_to_hbm [thread:$0]  (%p2191_p10), %s2536_s28, 2048, %s2524_s30, %s1230_s29, %s2065_s11, %s2065_s11, %s2066_s23  }
 0x1c1   : > { %s1235_s25 = scalar_lea.sflag [#allocation9], %s2247_s7  ;;  %s1965_s27 = scalar_lea.vmem %s2546_s9, 4096 }
 0x1c2   : > { %p1966_p12 = scmp.ne.s32.totalorder %s2546_s9, %s1965_s27  ;;  %s2067_s22 = smov [#allocation8]  }
 0x1c3   : > { %s1969_s14 = sshll.u32 %s2067_s22, 4  ;;  %s1970_s14 = int_to_ptr.vmem [resolvable:$false] %s1969_s14 }
 0x1c4   : > { %p1967_p11 = pnand %p1966_p12, %p2191_p10  ;;  %s1971_s21 = scalar_lea.vmem %s1970_s14, 8192 }
 0x1c5   : > { %p1972_p5 = scmp.lt.s32.totalorder %s2546_s9, %s1970_s14  ;;  %p1973_p9 = scmp.lt.s32.totalorder %s1971_s21, %s1965_s27 }
 0x1c6   : > { %p1968_p0 = pneg %p1967_p11 }
 0x1c7   : > { %p1974_p1 = por %p1973_p9, %p1972_p5 }
 0x1c9   : > { %p1975_p2 = pnand %p1974_p1, %p1968_p0 }
 0x1cb   : > { %1978 = shalt.err (!%p1975_p2)
}
 0x1cc   : > { %s1979_s28 = scalar_lea.hbm %s2544_s12, 4096  ;;  %s1983_s13 = scalar_lea.hbm %s2629_s4, 8192 }
 0x1cd   : > { %p1980_p3 = scmp.ne.s32.totalorder %s2544_s12, %s1979_s28  ;;  %p1984_p4 = scmp.lt.u32.totalorder %s2544_s12, %s2629_s4 }
 0x1ce   : > { %p1985_p6 = scmp.lt.u32.totalorder %s1983_s13, %s1979_s28  ;;  %p1987_p12 = scmp.lt.u32.totalorder %s1979_s28, %s2544_s12 }
 0x1cf   : > { %p1981_p7 = pnand %p1980_p3, %p2191_p10 }
 0x1d0   : > { %p1986_p8 = por %p1985_p6, %p1984_p4 }
 0x1d1   : > { %p1982_p13 = pneg %p1981_p7 }
 0x1d2   : > { %p1988_p11 = por %p1987_p12, %p1986_p8 }
 0x1d4   : > { %p1989_p0 = pnand %p1988_p11, %p1982_p13 }
 0x1d6   : > { %1992 = shalt.err (!%p1989_p0)
}
 0x1d7   : > { %s2068_s18 = smov 128   ;;  %s2069_s11 = smov 8  }
 0x1d8   : > { %1767 = dma.vmem_to_hbm [thread:$0]  (%p2191_p10), %s2546_s9, 4096, %s2544_s12, %s1235_s25, %s2068_s18, %s2068_s18, %s2069_s11  }
 0x1d9 PF: > { %s1284_s23 = sand.u32 1, %s2035_s15   ;;  %p2647_p5 = scmp.ne.s32.totalorder %s2637_s26, 0 }
 0x1da   : > { %p2648_p9 = scmp.ge.s32.totalorder %s2055_s20, 2  ;;  %s1285_s27 = scalar_lea.sflag [#allocation4], %s1284_s23 }
 0x1dc   : > { %p1779_p1 = pnand %p2648_p9, %p2647_p5 }
 0x1de   : > { %2026 = dma.done.wait (!%p1779_p1), %s1285_s27, 2048  }
 0x1df   : > { %2028 = vsyncadd (!%p1779_p1), %s1285_s27, 4294965248  ;;  %s1294_s22 = scalar_lea.sflag [#allocation9], %s1284_s23 }
 0x1e0   : > { %2030 = dma.done.wait (!%p1779_p1), %s1294_s22, 4096  }
 0x1e1   : > { %2032 = vsyncadd (!%p1779_p1), %s1294_s22, 4294963200  ;;  %s25_s20 = sadd.s32 1, %s2055_s20   ;;  %s2649_s15 = smov %s2039_s16 }
 0x1e2   : > { %p22_p2 = scmp.ge.s32.totalorder %s25_s20, 4   ;;  %s2650_s16 = smov %s2043_s17 }
 0x1e3   : > { %s2651_s17 = smov %s2200_s10  ;;  %s2652_s18 = smov %s2051_s19 }
 0x1e4   : > { %s2653_s19 = smov %s2655_s5  ;;  %24 = sbr.rel (!%p22_p2) target bundleno = 9 (0x9), region = 98 }
 0x1eb   :  { %1299 = vsyncpa [#allocation3], 1 }
 0x1ec   :  { %1301 = vsyncpa [#allocation3 + $0x1], 1 }
 0x1ed   :  { %1302 = vsyncpa [#allocation6], 1 }
 0x1ee   :  { %1303 = vsyncpa [#allocation4], 1 }
 0x1ef   :  { %1305 = vsyncpa [#allocation4 + $0x1], 1 }
 0x1f0   :  { %1306 = vsyncpa [#allocation9], 1 }
 0x1f1   :  { %1308 = vsyncpa [#allocation9 + $0x1], 1 }

</bundles_post_ra>
